<compile_context>
chip_gen: v7x
topology: tpu7x:2x2x1
jax: 0.10.0
libtpu: 0.0.40
codegen_flags: <defaults>
</compile_context>

<pallas_src>
import functools

import jax
import jax.numpy as jnp
from jax.experimental import pallas as pl
from jax.experimental.pallas import tpu as pltpu


def _attention_kernel(x_ref, wq_ref, wk_ref, wv_ref, wo_ref, bo_ref, o_ref,
                      *, heads, dim_head):
    """Multi-head self-attention for one batch element.

    x_ref  : (1, N, D)            f32 activations
    wq/wk/wv_ref : (H, D, dh)     bf16 (1/sqrt(dh) pre-folded into wq)
    wo_ref : (H, dh, D)           bf16
    bo_ref : (1, D)               f32
    o_ref  : (1, N, D)
    """
    N, D = x_ref.shape[1], x_ref.shape[2]

    xb = x_ref[0].astype(jnp.bfloat16)                       # (N, D)
    xh = jnp.broadcast_to(xb[None], (heads, N, D))           # (H, N, D), hoisted once

    # QKV projections: heads batched, contraction over the full model dim D.
    q = jnp.einsum('hnd,hdk->hnk', xh, wq_ref[...],
                   preferred_element_type=jnp.float32)       # (H, N, dh), scale folded
    k = jnp.einsum('hnd,hdk->hnk', xh, wk_ref[...],
                   preferred_element_type=jnp.float32)
    v = jnp.einsum('hnd,hdk->hnk', xh, wv_ref[...],
                   preferred_element_type=jnp.float32)

    # Scores + numerically-stable softmax (f32 elementwise path).
    dots = jnp.einsum('hid,hjd->hij', q.astype(jnp.bfloat16), k.astype(jnp.bfloat16),
                      preferred_element_type=jnp.float32)    # (H, N, N)
    dots = dots - jnp.max(dots, axis=-1, keepdims=True)
    e = jnp.exp(dots)
    attn = e * pl.reciprocal(jnp.sum(e, axis=-1, keepdims=True), approx=True)

    # Attention-weighted values, heads batched.
    out = jnp.einsum('hij,hjd->hid', attn.astype(jnp.bfloat16), v.astype(jnp.bfloat16),
                     preferred_element_type=jnp.float32)     # (H, N, dh)

    # Output projection without concatenating heads:
    # per-head (N,dh)@(dh,D), then sum over the (cheap, leading) head axis.
    proj_h = jnp.einsum('hid,hde->hie', out.astype(jnp.bfloat16), wo_ref[...],
                        preferred_element_type=jnp.float32)  # (H, N, D)
    proj = jnp.sum(proj_h, axis=0) + bo_ref[...]             # (N, D) + (1, D)
    o_ref[0] = proj.astype(o_ref.dtype)


def attention_forward(x, w_qkv, w_out, b_out, *, heads, dim_head):
    """x: (B, N, D).  w_qkv: (3*inner, D), w_out: (D, inner), b_out: (D,) in PyTorch Linear layout."""
    B, N, D = x.shape
    inner = heads * dim_head
    scale = dim_head ** (-0.5)

    # ---- Host-side weight re-layout (done once, outside the kernel) ----
    # to_qkv: y = x @ w_qkv.T ; chunk(3) then rearrange 'b n (h d) -> b h n d'.
    wq, wk, wv = jnp.split(w_qkv, 3, axis=0)                 # each (inner, D)

    def to_heads_dk(w):                                      # (inner, D) -> (H, D, dh)
        return w.reshape(heads, dim_head, D).transpose(0, 2, 1)

    wq_h = (to_heads_dk(wq) * scale).astype(jnp.bfloat16)    # fold attention scale into Q
    wk_h = to_heads_dk(wk).astype(jnp.bfloat16)
    wv_h = to_heads_dk(wv).astype(jnp.bfloat16)
    # to_out: y = attn_cat @ w_out.T + b ; attn_cat column index = h*dh + d.
    wo_h = w_out.T.reshape(heads, dim_head, D).astype(jnp.bfloat16)   # (H, dh, D)
    bo = b_out.reshape(1, D).astype(jnp.float32)

    kernel = functools.partial(_attention_kernel, heads=heads, dim_head=dim_head)

    flops = int(B * (3 * 2 * N * D * inner                      # qkv projections
                     + 2 * 2 * heads * N * N * dim_head         # scores + attn@v
                     + 2 * N * inner * D))                      # output projection
    bytes_accessed = int(2 * x.size * x.dtype.itemsize          # x in + out
                         + 2 * (wq_h.size + wk_h.size + wv_h.size + wo_h.size)
                         + 4 * bo.size)
    cost = pl.CostEstimate(flops=flops,
                           transcendentals=int(B * heads * N * N),
                           bytes_accessed=bytes_accessed)

    return pl.pallas_call(
        kernel,
        out_shape=jax.ShapeDtypeStruct((B, N, D), x.dtype),
        grid=(B,),
        in_specs=[
            pl.BlockSpec((1, N, D), lambda b: (b, 0, 0)),
            pl.BlockSpec((heads, D, dim_head), lambda b: (0, 0, 0)),
            pl.BlockSpec((heads, D, dim_head), lambda b: (0, 0, 0)),
            pl.BlockSpec((heads, D, dim_head), lambda b: (0, 0, 0)),
            pl.BlockSpec((heads, dim_head, D), lambda b: (0, 0, 0)),
            pl.BlockSpec((1, D), lambda b: (0, 0)),
        ],
        out_specs=pl.BlockSpec((1, N, D), lambda b: (b, 0, 0)),
        compiler_params=pltpu.CompilerParams(dimension_semantics=("parallel",)),
        cost_estimate=cost,
    )(x, wq_h, wk_h, wv_h, wo_h, bo)


def reference_attention(x, w_qkv, w_out, b_out, *, heads, dim_head):
    """Pure-JAX f32 reference mirroring the PyTorch module (dropout=0, eval)."""
    B, N, D = x.shape
    inner = heads * dim_head
    scale = dim_head ** (-0.5)
    qkv = x @ w_qkv.T                                        # (B, N, 3*inner)
    q, k, v = jnp.split(qkv, 3, axis=-1)

    def to_heads(t):
        return t.reshape(B, N, heads, dim_head).transpose(0, 2, 1, 3)

    qh, kh, vh = map(to_heads, (q, k, v))
    dots = jnp.einsum('bhid,bhjd->bhij', qh, kh) * scale
    attn = jax.nn.softmax(dots, axis=-1)
    out = jnp.einsum('bhij,bhjd->bhid', attn, vh)
    out = out.transpose(0, 2, 1, 3).reshape(B, N, inner)
    return out @ w_out.T + b_out


if __name__ == "__main__":
    # Small shapes consistent with the module's forward: x is (batch, tokens, dim).
    B, N, dim = 2, 8, 32
    heads, dim_head = 4, 8
    inner = heads * dim_head

    root = jax.random.PRNGKey(0)
    kx, k1, k2, k3 = jax.random.split(root, 4)
    x = jax.random.normal(kx, (B, N, dim), jnp.float32)
    w_qkv = 0.05 * jax.random.normal(k1, (3 * inner, dim), jnp.float32)   # to_qkv.weight
    w_out = 0.05 * jax.random.normal(k2, (dim, inner), jnp.float32)       # to_out[0].weight
    b_out = 0.02 * jax.random.normal(k3, (dim,), jnp.float32)             # to_out[0].bias

    out = attention_forward(x, w_qkv, w_out, b_out, heads=heads, dim_head=dim_head)
    out = jax.block_until_ready(out)

    ref = reference_attention(x, w_qkv, w_out, b_out, heads=heads, dim_head=dim_head)
    max_err = float(jnp.max(jnp.abs(out - ref)))
    if not jnp.allclose(out, ref, atol=2e-2, rtol=2e-2):
        raise AssertionError(f"Pallas output does not match reference (max abs err {max_err})")
    print("KERNEL_OK")
</pallas_src>

<mosaic_0001>
module attributes {stable_mosaic.version = 11 : i64} {
  func.func @_attention_kernel(%arg0: i32, %arg1: memref<1x8x32xf32, #tpu.memory_space<vmem>>, %arg2: memref<4x32x8xbf16, #tpu.memory_space<vmem>>, %arg3: memref<4x32x8xbf16, #tpu.memory_space<vmem>>, %arg4: memref<4x32x8xbf16, #tpu.memory_space<vmem>>, %arg5: memref<4x8x32xbf16, #tpu.memory_space<vmem>>, %arg6: memref<1x32xf32, #tpu.memory_space<vmem>>, %arg7: memref<1x8x32xf32, #tpu.memory_space<vmem>>) attributes {dimension_semantics = [#tpu.dimension_semantics<parallel>], iteration_bounds = array<i64: 2>, scalar_prefetch = 0 : i64, scratch_operands = 0 : i64, tpu.core_type = #tpu.core_type<tc>, window_params = [{transform_indices = @transform_0, window_bounds = array<i64: 1, 8, 32>}, {pipeline_mode = #tpu.pipeline_mode<synchronous>, transform_indices = @transform_1, window_bounds = array<i64: 4, 32, 8>}, {pipeline_mode = #tpu.pipeline_mode<synchronous>, transform_indices = @transform_2, window_bounds = array<i64: 4, 32, 8>}, {pipeline_mode = #tpu.pipeline_mode<synchronous>, transform_indices = @transform_3, window_bounds = array<i64: 4, 32, 8>}, {pipeline_mode = #tpu.pipeline_mode<synchronous>, transform_indices = @transform_4, window_bounds = array<i64: 4, 8, 32>}, {pipeline_mode = #tpu.pipeline_mode<synchronous>, transform_indices = @transform_5, window_bounds = array<i64: 1, 32>}, {transform_indices = @transform_6, window_bounds = array<i64: 1, 8, 32>}]} {
    %c0 = arith.constant 0 : index
    %c0_0 = arith.constant 0 : index
    %c0_1 = arith.constant 0 : index
    %0 = vector.load %arg1[%c0, %c0_0, %c0_1] : memref<1x8x32xf32, #tpu.memory_space<vmem>>, vector<1x8x32xf32>
    %1 = vector.shape_cast %0 : vector<1x8x32xf32> to vector<8x32xf32>
    %2 = arith.truncf %1 : vector<8x32xf32> to vector<8x32xbf16>
    %3 = vector.shape_cast %2 : vector<8x32xbf16> to vector<1x8x32xbf16>
    %4 = vector.shape_cast %3 : vector<1x8x32xbf16> to vector<1x8x32xbf16>
    %5 = vector.broadcast %4 : vector<1x8x32xbf16> to vector<4x8x32xbf16>
    %c0_2 = arith.constant 0 : index
    %c0_3 = arith.constant 0 : index
    %c0_4 = arith.constant 0 : index
    %6 = vector.load %arg2[%c0_2, %c0_3, %c0_4] : memref<4x32x8xbf16, #tpu.memory_space<vmem>>, vector<4x32x8xbf16>
    "tpu.trace_start"() <{level = 10 : i32, message = "hnd,hdk->hnk"}> : () -> ()
    %cst = arith.constant dense<0.000000e+00> : vector<4x8x8xf32>
    %7 = tpu.matmul %5, %6, %cst {dimension_numbers = #tpu.dot_dimension_numbers<[2], [1], [1], [2], [0, 0, 0, 1, 1, 2], [0], [0]>} : vector<4x8x32xbf16>, vector<4x32x8xbf16>, vector<4x8x8xf32> -> vector<4x8x8xf32>
    "tpu.trace_stop"() : () -> ()
    %c0_5 = arith.constant 0 : index
    %c0_6 = arith.constant 0 : index
    %c0_7 = arith.constant 0 : index
    %8 = vector.load %arg3[%c0_5, %c0_6, %c0_7] : memref<4x32x8xbf16, #tpu.memory_space<vmem>>, vector<4x32x8xbf16>
    "tpu.trace_start"() <{level = 10 : i32, message = "hnd,hdk->hnk"}> : () -> ()
    %cst_8 = arith.constant dense<0.000000e+00> : vector<4x8x8xf32>
    %9 = tpu.matmul %5, %8, %cst_8 {dimension_numbers = #tpu.dot_dimension_numbers<[2], [1], [1], [2], [0, 0, 0, 1, 1, 2], [0], [0]>} : vector<4x8x32xbf16>, vector<4x32x8xbf16>, vector<4x8x8xf32> -> vector<4x8x8xf32>
    "tpu.trace_stop"() : () -> ()
    %c0_9 = arith.constant 0 : index
    %c0_10 = arith.constant 0 : index
    %c0_11 = arith.constant 0 : index
    %10 = vector.load %arg4[%c0_9, %c0_10, %c0_11] : memref<4x32x8xbf16, #tpu.memory_space<vmem>>, vector<4x32x8xbf16>
    "tpu.trace_start"() <{level = 10 : i32, message = "hnd,hdk->hnk"}> : () -> ()
    %cst_12 = arith.constant dense<0.000000e+00> : vector<4x8x8xf32>
    %11 = tpu.matmul %5, %10, %cst_12 {dimension_numbers = #tpu.dot_dimension_numbers<[2], [1], [1], [2], [0, 0, 0, 1, 1, 2], [0], [0]>} : vector<4x8x32xbf16>, vector<4x32x8xbf16>, vector<4x8x8xf32> -> vector<4x8x8xf32>
    "tpu.trace_stop"() : () -> ()
    %12 = arith.truncf %7 : vector<4x8x8xf32> to vector<4x8x8xbf16>
    %13 = arith.truncf %9 : vector<4x8x8xf32> to vector<4x8x8xbf16>
    "tpu.trace_start"() <{level = 10 : i32, message = "hid,hjd->hij"}> : () -> ()
    %cst_13 = arith.constant dense<0.000000e+00> : vector<4x8x8xf32>
    %14 = tpu.matmul %12, %13, %cst_13 {dimension_numbers = #tpu.dot_dimension_numbers<[2], [2], [1], [1], [0, 0, 0, 1, 1, 1], [0], [0]>} : vector<4x8x8xbf16>, vector<4x8x8xbf16>, vector<4x8x8xf32> -> vector<4x8x8xf32>
    "tpu.trace_stop"() : () -> ()
    %cst_14 = arith.constant dense<0xFF800000> : vector<4x8xf32>
    %15 = vector.multi_reduction <maximumf>, %14, %cst_14 [2] : vector<4x8x8xf32> to vector<4x8xf32>
    %16 = vector.shape_cast %15 : vector<4x8xf32> to vector<4x8x1xf32>
    %17 = vector.broadcast %16 : vector<4x8x1xf32> to vector<4x8x8xf32>
    %18 = arith.subf %14, %17 : vector<4x8x8xf32>
    %19 = math.exp %18 : vector<4x8x8xf32>
    %cst_15 = arith.constant dense<0.000000e+00> : vector<4x8xf32>
    %20 = vector.multi_reduction <add>, %19, %cst_15 [2] : vector<4x8x8xf32> to vector<4x8xf32>
    %21 = vector.shape_cast %20 : vector<4x8xf32> to vector<4x8x1xf32>
    %22 = tpu.reciprocal %21 {approx = true} : vector<4x8x1xf32> -> vector<4x8x1xf32>
    %23 = vector.broadcast %22 : vector<4x8x1xf32> to vector<4x8x8xf32>
    %24 = arith.mulf %19, %23 : vector<4x8x8xf32>
    %25 = arith.truncf %24 : vector<4x8x8xf32> to vector<4x8x8xbf16>
    %26 = arith.truncf %11 : vector<4x8x8xf32> to vector<4x8x8xbf16>
    "tpu.trace_start"() <{level = 10 : i32, message = "hij,hjd->hid"}> : () -> ()
    %cst_16 = arith.constant dense<0.000000e+00> : vector<4x8x8xf32>
    %27 = tpu.matmul %25, %26, %cst_16 {dimension_numbers = #tpu.dot_dimension_numbers<[2], [1], [1], [2], [0, 0, 0, 1, 1, 2], [0], [0]>} : vector<4x8x8xbf16>, vector<4x8x8xbf16>, vector<4x8x8xf32> -> vector<4x8x8xf32>
    "tpu.trace_stop"() : () -> ()
    %28 = arith.truncf %27 : vector<4x8x8xf32> to vector<4x8x8xbf16>
    %c0_17 = arith.constant 0 : index
    %c0_18 = arith.constant 0 : index
    %c0_19 = arith.constant 0 : index
    %29 = vector.load %arg5[%c0_17, %c0_18, %c0_19] : memref<4x8x32xbf16, #tpu.memory_space<vmem>>, vector<4x8x32xbf16>
    "tpu.trace_start"() <{level = 10 : i32, message = "hid,hde->hie"}> : () -> ()
    %cst_20 = arith.constant dense<0.000000e+00> : vector<4x8x32xf32>
    %30 = tpu.matmul %28, %29, %cst_20 {dimension_numbers = #tpu.dot_dimension_numbers<[2], [1], [1], [2], [0, 0, 0, 1, 1, 2], [0], [0]>} : vector<4x8x8xbf16>, vector<4x8x32xbf16>, vector<4x8x32xf32> -> vector<4x8x32xf32>
    "tpu.trace_stop"() : () -> ()
    %cst_21 = arith.constant dense<0.000000e+00> : vector<8x32xf32>
    %31 = vector.multi_reduction <add>, %30, %cst_21 [0] : vector<4x8x32xf32> to vector<8x32xf32>
    %c0_22 = arith.constant 0 : index
    %c0_23 = arith.constant 0 : index
    %32 = vector.load %arg6[%c0_22, %c0_23] : memref<1x32xf32, #tpu.memory_space<vmem>>, vector<1x32xf32>
    %33 = vector.broadcast %32 : vector<1x32xf32> to vector<8x32xf32>
    %34 = arith.addf %31, %33 : vector<8x32xf32>
    %c0_24 = arith.constant 0 : index
    %c0_25 = arith.constant 0 : index
    %c0_26 = arith.constant 0 : index
    %35 = vector.load %arg7[%c0_24, %c0_25, %c0_26] : memref<1x8x32xf32, #tpu.memory_space<vmem>>, vector<1x8x32xf32>
    %36 = vector.shape_cast %35 : vector<1x8x32xf32> to vector<8x32xf32>
    %37 = vector.shape_cast %34 : vector<8x32xf32> to vector<1x8x32xf32>
    tpu.vector_store %arg7[%c0_24, %c0_25, %c0_26], %37 {strides = array<i32>} : memref<1x8x32xf32, #tpu.memory_space<vmem>>, vector<1x8x32xf32>,
    return
  }
  func.func @transform_0(%arg0: i32) -> (i32, i32, i32) {
    %c0_i32 = arith.constant 0 : i32
    %c0_i32_0 = arith.constant 0 : i32
    %c0_i32_1 = arith.constant 0 : i32
    return %arg0, %c0_i32, %c0_i32_0 : i32, i32, i32
  }
  func.func @transform_1(%arg0: i32) -> (i32, i32, i32) {
    %c0_i32 = arith.constant 0 : i32
    %c0_i32_0 = arith.constant 0 : i32
    %c0_i32_1 = arith.constant 0 : i32
    %c0_i32_2 = arith.constant 0 : i32
    return %c0_i32, %c0_i32_0, %c0_i32_1 : i32, i32, i32
  }
  func.func @transform_2(%arg0: i32) -> (i32, i32, i32) {
    %c0_i32 = arith.constant 0 : i32
    %c0_i32_0 = arith.constant 0 : i32
    %c0_i32_1 = arith.constant 0 : i32
    %c0_i32_2 = arith.constant 0 : i32
    return %c0_i32, %c0_i32_0, %c0_i32_1 : i32, i32, i32
  }
  func.func @transform_3(%arg0: i32) -> (i32, i32, i32) {
    %c0_i32 = arith.constant 0 : i32
    %c0_i32_0 = arith.constant 0 : i32
    %c0_i32_1 = arith.constant 0 : i32
    %c0_i32_2 = arith.constant 0 : i32
    return %c0_i32, %c0_i32_0, %c0_i32_1 : i32, i32, i32
  }
  func.func @transform_4(%arg0: i32) -> (i32, i32, i32) {
    %c0_i32 = arith.constant 0 : i32
    %c0_i32_0 = arith.constant 0 : i32
    %c0_i32_1 = arith.constant 0 : i32
    %c0_i32_2 = arith.constant 0 : i32
    return %c0_i32, %c0_i32_0, %c0_i32_1 : i32, i32, i32
  }
  func.func @transform_5(%arg0: i32) -> (i32, i32) {
    %c0_i32 = arith.constant 0 : i32
    %c0_i32_0 = arith.constant 0 : i32
    %c0_i32_1 = arith.constant 0 : i32
    return %c0_i32, %c0_i32_0 : i32, i32
  }
  func.func @transform_6(%arg0: i32) -> (i32, i32, i32) {
    %c0_i32 = arith.constant 0 : i32
    %c0_i32_0 = arith.constant 0 : i32
    %c0_i32_1 = arith.constant 0 : i32
    return %arg0, %c0_i32, %c0_i32_0 : i32, i32, i32
  }
}

</mosaic_0001>

<bundles_post_ra>
// kernel: tpu_custom_call.1
= control target key start
LH: loop header
LB: loop body
LE: loop exit
PB: predicated region body
PF: predicated region fallthrough
CT: control target
= control target key end

     0   :  { %11 = vsyncpa [#allocation3], 0  ;;  %s2449_s0 = inlined_call_operand.vmem [shape: f32[2,8,32], index: 0, kind: input, shape index: {}]   ;;  %s2450_s1 = inlined_call_operand.vmem [shape: bf16[4,32,8], index: 1, kind: input, shape index: {}]   ;;  %s2451_s2 = inlined_call_operand.vmem [shape: bf16[4,32,8], index: 2, kind: input, shape index: {}]   ;;  %s2452_s3 = inlined_call_operand.vmem [shape: bf16[4,32,8], index: 3, kind: input, shape index: {}]   ;;  %s2453_s4 = inlined_call_operand.vmem [shape: bf16[4,8,32], index: 4, kind: input, shape index: {}]   ;;  %s2454_s5 = inlined_call_operand.vmem [shape: f32[1,32], index: 5, kind: input, shape index: {}]   ;;  %s2455_s6 = inlined_call_operand.hbm [shape: f32[2,8,32], index: 6, kind: output, shape index: {}]  }
   0x1   :  { %13 = vsyncpa [#allocation3 + $0x1], 0  ;;  %s2107_s21 = smov 0   ;;  %s2109_s22 = smov 0  }
   0x2   :  { %s2111_s23 = smov 0   ;;  %s2113_s24 = smov 0  }
   0x3 LB: > { %s2128_s25 = sadd.s32 4294967295, %s2067_s24   ;;  %s1637_s26 = sadd.s32 4294967294, %s2067_s24   ;;  %s2067_s24 = sphi %s2113_s24, %s2461_s24   ;;  %s2063_s23 = sphi %s2111_s23, %s2460_s23   ;;  %s2059_s22 = sphi %s2109_s22, %s2459_s22   ;;  %s2055_s21 = sphi %s2107_s21, %s2458_s21  }
   0x4   : > { %s2132_s27 = sadd.s32 1, %s2067_s24   ;;  %s157_s28 = sadd.s32 1, %s2063_s23 }
   0x5   : > { %s154_s29 = ssub.s32 %s2067_s24, %s2132_s27  ;;  %p167_p0 = scmp.ne.s32.totalorder %s2063_s23, %s2059_s22 }
   0x6   : > { %p155_p1 = scmp.eq.s32.totalorder %s154_s29, 0  ;;  %p168_p2 = scmp.eq.s32.totalorder %s2128_s25, 1 }
   0x7   : > { %p173_p3 = scmp.ne.s32.totalorder %s2059_s22, %s2055_s21  ;;  %p174_p4 = scmp.eq.s32.totalorder %s1637_s26, 1 }
   0x8   : > { %s2143_s30 = scalar_select %p155_p1, %s2063_s23, %s157_s28  }
   0x9   : > { %p2145_p5 = por %p168_p2, %p167_p0  ;;  %p2149_p6 = por %p174_p4, %p173_p3 }
   0xa   : > { %p1640_p7 = scmp.ge.s32.totalorder %s2067_s24, 1  ;;  %p214_p8 = scmp.lt.s32.totalorder %s2067_s24, 3 }
   0xc   : > { %p215_p9 = pnand %p1640_p7, %p214_p8 }
   0xd   : > { %v1965_v0 = vld [vmem:[%s2450_s1] sm:$0xff] (!%p215_p9)   ;;  %v2069_v1 = vmov (!%p215_p9), 0.0   ;;  %v1966_v2 = vld [vmem:[%s2450_s1 + $0x10] sm:$0xff] (!%p215_p9)   ;;  %v1967_v3 = vld [vmem:[%s2450_s1 + $0x8] sm:$0xff] (!%p215_p9)   ;;  %vm2070_vm0 = vmmov (!%p215_p9), 0   ;;  %p243_p10 = scmp.lt.s32.totalorder (!%p215_p9), %s2128_s25, 1 }
   0xe   : > { %218 = sbr.rel (%p215_p9) target bundleno = 1251 (0x4e3), region = 44  ;;  %1756 = vmatprep.subr.bf16.mxu0 (!%p215_p9), %v2069_v1  ;;  %1764 = vmatprep.subr.bf16.mxu1 (!%p215_p9), %v2069_v1  ;;  %v1968_v4 = vld [vmem:[%s2450_s1 + $0x18] sm:$0xff] (!%p215_p9)   ;;  %v1969_v5 = vld [vmem:[%s2450_s1 + $0x20] sm:$0xff] (!%p215_p9)   ;;  %v1970_v6 = vld [vmem:[%s2450_s1 + $0x30] sm:$0xff] (!%p215_p9)   ;;  %vm278_vm1 = vcmask (!%p215_p9), 261120   ;;  %vm934_vm2 = vcmask (!%p215_p9), 64512  }
   0xf   : > { %1757 = vmatpush3.bf16.msra.mxu0 (!%p215_p9), %v1965_v0  ;;  %1760 = vmatprep.mubr.msk.bf16.mxu0 (!%p215_p9), %vm2070_vm0, %v2069_v1  ;;  %v1971_v9 = vld [vmem:[%s2450_s1 + $0x28] sm:$0xff] (!%p215_p9)   ;;  %v1972_v10 = vld [vmem:[%s2450_s1 + $0x38] sm:$0xff] (!%p215_p9)   ;;  %v1973_v11 = vld [vmem:[%s2451_s2] sm:$0xff] (!%p215_p9)   ;;  %vm1174_vm3 = vcmask (!%p215_p9), 1043456   ;;  %s240_s10 = sand.u32 (!%p215_p9), 1, %s2059_s22   ;;  %s1693_s14 = sshll.u32 (!%p215_p9), %s2128_s25, 7 }
  0x10   : > { %1765 = vmatpush3.bf16.msra.mxu1 (!%p215_p9), %v1966_v2  ;;  %1758 = vmatprep.subr.bf16.mxu0 (!%p215_p9), %v2069_v1  ;;  %v1974_v12 = vld [vmem:[%s2451_s2 + $0x10] sm:$0xff] (!%p215_p9)   ;;  %v1975_v13 = vld [vmem:[%s2451_s2 + $0x8] sm:$0xff] (!%p215_p9)   ;;  %v1976_v14 = vld [vmem:[%s2451_s2 + $0x18] sm:$0xff] (!%p215_p9)   ;;  %s1641_s11 = sshll.u32 (!%p215_p9), %s240_s10, 3  ;;  %s2406_s19 = scalar_lea.hbm (!%p215_p9), %s2455_s6, %s1693_s14 }
  0x11   : > { %1766 = vmatprep.subr.bf16.mxu1 (!%p215_p9), %v2069_v1  ;;  %1768 = vmatprep.mubr.msk.bf16.mxu1 (!%p215_p9), %vm2070_vm0, %v2069_v1  ;;  %v1977_v15 = vld [vmem:[%s2451_s2 + $0x20] sm:$0xff] (!%p215_p9)   ;;  %v1978_v16 = vld [vmem:[%s2451_s2 + $0x30] sm:$0xff] (!%p215_p9)   ;;  %v1979_v17 = vld [vmem:[%s2451_s2 + $0x28] sm:$0xff] (!%p215_p9)   ;;  %s242_s15 = scalar_lea.vmem (!%p215_p9), [#allocation2], %s1641_s11  ;;  %s1565_s20 = scalar_lea.sflag (!%p215_p9), [#allocation3], %s240_s10 }
  0x12   : > { %v1980_v18 = vld [vmem:[%s2451_s2 + $0x38] sm:$0xff] (!%p215_p9)   ;;  %v1981_v19 = vld [vmem:[%s2452_s3] sm:$0xff] (!%p215_p9)   ;;  %v1982_v20 = vld [vmem:[%s2452_s3 + $0x10] sm:$0xff] (!%p215_p9)   ;;  %s1578_s16 = sshll.u32 (!%p215_p9), %s242_s15, 4  ;;  %s2071_s26 = smov (!%p215_p9), [#allocation2]   ;;  %s2408_s16 = int_to_ptr.vmem [resolvable:$true] %s1578_s16 }
  0x13   : > { %1759 = vmatpush3.bf16.msra.mxu0 (!%p215_p9), %v1967_v3  ;;  %v1983_v21 = vld [vmem:[%s2452_s3 + $0x8] sm:$0xff] (!%p215_p9)   ;;  %v1984_v22 = vld [vmem:[%s2452_s3 + $0x18] sm:$0xff] (!%p215_p9)   ;;  %v1985_v23 = vld [vmem:[%s2452_s3 + $0x20] sm:$0xff] (!%p215_p9)   ;;  %s2009_s28 = sshll.u32 (!%p215_p9), %s2071_s26, 4  ;;  %s2010_s28 = int_to_ptr.vmem [resolvable:$false] %s2009_s28 }
  0x14   : > { %1767 = vmatpush3.bf16.msra.mxu1 (!%p215_p9), %v1968_v4  ;;  %1772 = vmatprep.subr.bf16.mxu0 (!%p215_p9), %v2069_v1  ;;  %v1986_v24 = vld [vmem:[%s2452_s3 + $0x30] sm:$0xff] (!%p215_p9)   ;;  %v1987_v25 = vld [vmem:[%s2452_s3 + $0x28] sm:$0xff] (!%p215_p9)   ;;  %v1988_v26 = vld [vmem:[%s2452_s3 + $0x38] sm:$0xff] (!%p215_p9)   ;;  %p2012_p0 = scmp.lt.s32.totalorder (!%p215_p9), %s2408_s16, %s2010_s28 }
  0x15   : > { %s244_s17 = scalar_select %p243_p10, %s2128_s25, 1  ;;  %1780 = vmatprep.subr.bf16.mxu1 %v2069_v1 }
  0x16   : > { %s2005_s25 = scalar_lea.vmem %s2408_s16, 128 }
  0x17   : > { %s1642_s18 = sshll.u32 %s244_s17, 3  ;;  %p2006_p11 = scmp.ne.s32.totalorder %s2408_s16, %s2005_s25 }
  0x18   : > { %s246_s29 = scalar_lea.vmem %s2449_s0, %s1642_s18 }
  0x19   : > { %v248_v7 = vld [vmem:[%s246_s29] sm:$0xff]  ;;  %p2007_p12 = pnand %p2006_p11, %p2145_p5  ;;  %s2011_s29 = scalar_lea.vmem %s2010_s28, 256 }
  0x1a   : > { %v2188_v8 = vpack.c.bf16 %v248_v7, %v248_v7  ;;  %p2013_p1 = scmp.lt.s32.totalorder %s2011_s29, %s2005_s25 }
  0x1b   : > { %p2008_p13 = pneg %p2007_p12 }
  0x1c   : > { %1761 = vmatmul.mubr.msk.bf16.vlgmr.msra.gmra.mrb[0].mxu0 %vm278_vm1, %v2188_v8  ;;  %1769 = vmatmul.mubr.msk.bf16.vlgmr.msra.gmra.mrb[0].mxu1 %vm278_vm1, %v2188_v8  ;;  %p2014_p2 = por %p2013_p1, %p2012_p0 }
  0x1d   : > { %1773 = vmatpush3.bf16.msra.mxu0 %v1969_v5  ;;  %1781 = vmatpush3.bf16.msra.mxu1 %v1970_v6 }
  0x1e   : > { %1774 = vmatprep.subr.bf16.mxu0 %v2069_v1  ;;  %1782 = vmatprep.subr.bf16.mxu1 %v2069_v1  ;;  %p2015_p3 = pnand %p2014_p2, %p2008_p13 }
  0x1f   : > { %1776 = vmatprep.mubr.msk.bf16.mxu0 %vm2070_vm0, %v2069_v1  ;;  %1784 = vmatprep.mubr.msk.bf16.mxu1 %vm2070_vm0, %v2069_v1 }
  0x21   : > { %1775 = vmatpush3.bf16.msra.mxu0 %v1971_v9  ;;  %1783 = vmatpush3.bf16.msra.mxu1 %v1972_v10 }
  0x22   : > { %1788 = vmatprep.subr.bf16.mxu0 %v2069_v1  ;;  %1796 = vmatprep.subr.bf16.mxu1 %v2069_v1 }
  0x24   : > { %1777 = vmatmul.mubr.msk.bf16.vlgmr.msra.gmra.mrb[4].mxu0 %vm278_vm1, %v2188_v8  ;;  %1785 = vmatmul.mubr.msk.bf16.vlgmr.msra.gmra.mrb[4].mxu1 %vm278_vm1, %v2188_v8 }
  0x25   : > { %1789 = vmatpush3.bf16.msra.mxu0 %v1973_v11  ;;  %1797 = vmatpush3.bf16.msra.mxu1 %v1974_v12 }
  0x26   : > { %1790 = vmatprep.subr.bf16.mxu0 %v2069_v1  ;;  %1798 = vmatprep.subr.bf16.mxu1 %v2069_v1 }
  0x27   : > { %1792 = vmatprep.mubr.msk.bf16.mxu0 %vm2070_vm0, %v2069_v1  ;;  %1800 = vmatprep.mubr.msk.bf16.mxu1 %vm2070_vm0, %v2069_v1 }
  0x29   : > { %1791 = vmatpush3.bf16.msra.mxu0 %v1975_v13  ;;  %1799 = vmatpush3.bf16.msra.mxu1 %v1976_v14 }
  0x2a   : > { %1804 = vmatprep.subr.bf16.mxu0 %v2069_v1  ;;  %1812 = vmatprep.subr.bf16.mxu1 %v2069_v1 }
  0x2c   : > { %1793 = vmatmul.mubr.msk.bf16.vlgmr.msra.gmra.mrb[8].mxu0 %vm278_vm1, %v2188_v8  ;;  %1801 = vmatmul.mubr.msk.bf16.vlgmr.msra.gmra.mrb[8].mxu1 %vm278_vm1, %v2188_v8 }
  0x2d   : > { %1805 = vmatpush3.bf16.msra.mxu0 %v1977_v15  ;;  %1813 = vmatpush3.bf16.msra.mxu1 %v1978_v16 }
  0x2e   : > { %1806 = vmatprep.subr.bf16.mxu0 %v2069_v1  ;;  %1814 = vmatprep.subr.bf16.mxu1 %v2069_v1 }
  0x2f   : > { %1808 = vmatprep.mubr.msk.bf16.mxu0 %vm2070_vm0, %v2069_v1  ;;  %1816 = vmatprep.mubr.msk.bf16.mxu1 %vm2070_vm0, %v2069_v1 }
  0x31   : > { %1807 = vmatpush3.bf16.msra.mxu0 %v1979_v17  ;;  %1815 = vmatpush3.bf16.msra.mxu1 %v1980_v18 }
  0x32   : > { %1820 = vmatprep.subr.bf16.mxu0 %v2069_v1  ;;  %1828 = vmatprep.subr.bf16.mxu1 %v2069_v1 }
  0x34   : > { %1809 = vmatmul.mubr.msk.bf16.vlgmr.msra.gmra.mrb[12].mxu0 %vm278_vm1, %v2188_v8  ;;  %1817 = vmatmul.mubr.msk.bf16.vlgmr.msra.gmra.mrb[12].mxu1 %vm278_vm1, %v2188_v8 }
  0x35   : > { %1821 = vmatpush3.bf16.msra.mxu0 %v1981_v19  ;;  %1829 = vmatpush3.bf16.msra.mxu1 %v1982_v20 }
  0x36   : > { %1822 = vmatprep.subr.bf16.mxu0 %v2069_v1  ;;  %1830 = vmatprep.subr.bf16.mxu1 %v2069_v1 }
  0x37   : > { %1824 = vmatprep.mubr.msk.bf16.mxu0 %vm2070_vm0, %v2069_v1  ;;  %1832 = vmatprep.mubr.msk.bf16.mxu1 %vm2070_vm0, %v2069_v1 }
  0x39   : > { %1823 = vmatpush3.bf16.msra.mxu0 %v1983_v21  ;;  %1831 = vmatpush3.bf16.msra.mxu1 %v1984_v22 }
  0x3a   : > { %1836 = vmatprep.subr.bf16.mxu0 %v2069_v1  ;;  %1844 = vmatprep.subr.bf16.mxu1 %v2069_v1 }
  0x3c   : > { %1825 = vmatmul.mubr.msk.bf16.vlgmr.msra.gmra.mrb[16].mxu0 %vm278_vm1, %v2188_v8  ;;  %1833 = vmatmul.mubr.msk.bf16.vlgmr.msra.gmra.mrb[16].mxu1 %vm278_vm1, %v2188_v8 }
  0x3d   : > { %1837 = vmatpush3.bf16.msra.mxu0 %v1985_v23  ;;  %1840 = vmatprep.mubr.msk.bf16.mxu0 %vm2070_vm0, %v2069_v1 }
  0x3e   : > { %1838 = vmatprep.subr.bf16.mxu0 %v2069_v1  ;;  %1845 = vmatpush3.bf16.msra.mxu1 %v1986_v24 }
  0x3f   : > { %1848 = vmatprep.mubr.msk.bf16.mxu1 %vm2070_vm0, %v2069_v1  ;;  %1846 = vmatprep.subr.bf16.mxu1 %v2069_v1 }
  0x41   : > { %1839 = vmatpush3.bf16.msra.mxu0 %v1987_v25 }
  0x42   : > { %1847 = vmatpush3.bf16.msra.mxu1 %v1988_v26  ;;  %1852 = vmatprep.subr.bf16.mxu0 %v2069_v1 }
  0x43   : > { %1858 = vmatprep.subr.bf16.mxu1 %v2069_v1 }
  0x44   : > { %1841 = vmatmul.mubr.msk.bf16.vlgmr.msra.gmra.mrb[20].mxu0 %vm278_vm1, %v2188_v8 }
  0x45   : > { %1849 = vmatmul.mubr.msk.bf16.vlgmr.msra.gmra.mrb[20].mxu1 %vm278_vm1, %v2188_v8  ;;  %1854 = vmatprep.mubr.msk.bf16.mxu0 %vm2070_vm0, %v2069_v1 }
  0x46   : > { %1860 = vmatprep.mubr.msk.bf16.mxu1 %vm2070_vm0, %v2069_v1 }
  0xef   : > { %v316_v27 = vpop.f32.mrb[0].mxu0  ;;  %v368_v28 = vpop.f32.mrb[0].mxu1 }
  0xf0   : > { %v1762_v29 = vpop.f32.mrb[1].mxu0  ;;  %v1770_v30 = vpop.f32.mrb[1].mxu1  ;;  %v926_v57 = vpack.c.bf16 %v316_v27, %v316_v27  ;;  %v927_v58 = vpack.c.bf16 %v368_v28, %v368_v28 }
  0xf1   : > { %v319_v31 = vpop.f32.mrb[2].mxu0  ;;  %v371_v32 = vpop.f32.mrb[2].mxu1 }
  0xf2   : > { %v1763_v33 = vpop.f32.mrb[3].mxu0  ;;  %v1771_v34 = vpop.f32.mrb[3].mxu1 }
  0xf7   : > { %v420_v35 = vpop.f32.mrb[4].mxu0  ;;  %v472_v36 = vpop.f32.mrb[4].mxu1 }
  0xf8   : > { %v1778_v37 = vpop.f32.mrb[5].mxu0  ;;  %v1786_v38 = vpop.f32.mrb[5].mxu1  ;;  %v928_v6 = vpack.c.bf16 %v420_v35, %v420_v35  ;;  %v929_v7 = vpack.c.bf16 %v472_v36, %v472_v36 }
  0xf9   : > { %v423_v39 = vpop.f32.mrb[6].mxu0  ;;  %v475_v40 = vpop.f32.mrb[6].mxu1 }
  0xfa   : > { %v1779_v41 = vpop.f32.mrb[7].mxu0  ;;  %v1787_v42 = vpop.f32.mrb[7].mxu1 }
  0xff   : > { %v540_v43 = vpop.f32.mrb[8].mxu0  ;;  %v592_v44 = vpop.f32.mrb[8].mxu1 }
 0x100   : > { %v930_v45 = vpack.c.bf16 %v540_v43, %v540_v43  ;;  %v931_v46 = vpack.c.bf16 %v592_v44, %v592_v44  ;;  %v1794_v47 = vpop.f32.mrb[9].mxu0  ;;  %v1802_v48 = vpop.f32.mrb[9].mxu1 }
 0x101   : > { %v543_v49 = vpop.f32.mrb[10].mxu0  ;;  %v595_v50 = vpop.f32.mrb[10].mxu1 }
 0x102   : > { %v939_v51 = vsel %vm934_vm2, %v930_v45, 0  ;;  %v985_v52 = vsel %vm934_vm2, %v931_v46, 0  ;;  %v1795_v53 = vpop.f32.mrb[11].mxu0  ;;  %v1803_v54 = vpop.f32.mrb[11].mxu1 }
 0x103   : > { %1853 = vmatpush3.bf16.xpose.msra.mxu0 %v939_v51  ;;  %1859 = vmatpush3.bf16.xpose.msra.mxu1 %v985_v52 }
 0x104   : > { %1864 = vmatprep.subr.bf16.mxu0 %v2069_v1  ;;  %1870 = vmatprep.subr.bf16.mxu1 %v2069_v1 }
 0x107   : > { %v644_v55 = vpop.f32.mrb[12].mxu0  ;;  %v696_v56 = vpop.f32.mrb[12].mxu1 }
 0x108   : > { %v932_v59 = vpack.c.bf16 %v644_v55, %v644_v55  ;;  %v933_v60 = vpack.c.bf16 %v696_v56, %v696_v56  ;;  %v1810_v61 = vpop.f32.mrb[13].mxu0  ;;  %v1818_v62 = vpop.f32.mrb[13].mxu1 }
 0x109   : > { %v647_v63 = vpop.f32.mrb[14].mxu0  ;;  %v699_v0 = vpop.f32.mrb[14].mxu1 }
 0x10a   : > { %v1031_v2 = vsel %vm934_vm2, %v932_v59, 0  ;;  %v1077_v3 = vsel %vm934_vm2, %v933_v60, 0  ;;  %v1811_v4 = vpop.f32.mrb[15].mxu0  ;;  %1855 = vmatmul.mubr.msk.bf16.vlgmr.msra.gmra.mrb[24].mxu0 %vm934_vm2, %v926_v57  ;;  %1861 = vmatmul.mubr.msk.bf16.vlgmr.msra.gmra.mrb[24].mxu1 %vm934_vm2, %v927_v58  ;;  %v1819_v5 = vpop.f32.mrb[15].mxu1 }
 0x10b   : > { %1865 = vmatpush3.bf16.xpose.msra.mxu0 %v1031_v2  ;;  %1871 = vmatpush3.bf16.xpose.msra.mxu1 %v1077_v3 }
 0x10c   : > { %1866 = vmatprep.mubr.msk.bf16.mxu0 %vm2070_vm0, %v2069_v1  ;;  %1872 = vmatprep.mubr.msk.bf16.mxu1 %vm2070_vm0, %v2069_v1 }
 0x10d   : > { %1876 = vmatprep.subr.bf16.mxu0 %v2069_v1  ;;  %1882 = vmatprep.subr.bf16.mxu1 %v2069_v1 }
 0x10f   : > { %v764_v8 = vpop.f32.mrb[16].mxu0  ;;  %v816_v12 = vpop.f32.mrb[16].mxu1 }
 0x110   : > { %v1167_v9 = vpack.c.bf16 %v764_v8, %v764_v8  ;;  %v1826_v10 = vpop.f32.mrb[17].mxu0  ;;  %v1168_v15 = vpack.c.bf16 %v816_v12, %v816_v12  ;;  %v1834_v16 = vpop.f32.mrb[17].mxu1 }
 0x111   : > { %v767_v11 = vpop.f32.mrb[18].mxu0  ;;  %v819_v17 = vpop.f32.mrb[18].mxu1 }
 0x112   : > { %1867 = vmatmul.mubr.msk.bf16.vlgmr.msra.gmra.mrb[28].mxu0 %vm934_vm2, %v928_v6  ;;  %1873 = vmatmul.mubr.msk.bf16.vlgmr.msra.gmra.mrb[28].mxu1 %vm934_vm2, %v929_v7  ;;  %v1176_v13 = vsel %vm1174_vm3, %v1167_v9, 0  ;;  %v1827_v14 = vpop.f32.mrb[19].mxu0  ;;  %v1222_v18 = vsel %vm1174_vm3, %v1168_v15, 0  ;;  %v1835_v19 = vpop.f32.mrb[19].mxu1 }
 0x113   : > { %1878 = vmatprep.mubr.msk.bf16.mxu0 %vm2070_vm0, %v2069_v1  ;;  %1884 = vmatprep.mubr.msk.bf16.mxu1 %vm2070_vm0, %v2069_v1  ;;  %v1360_v19 = vld [vmem:[%s2453_s4] sm:$0xf] }
 0x114   : > { %1877 = vmatpush3.bf16.msra.mxu0 %v1176_v13  ;;  %1883 = vmatpush3.bf16.msra.mxu1 %v1222_v18 }
 0x115   : > { %1888 = vmatprep.subr.bf16.mxu0 %v2069_v1  ;;  %1894 = vmatprep.subr.bf16.mxu1 %v2069_v1 }
 0x117   : > { %v2336_v20 = vpop.f32.mrb[20].mxu0 }
 0x118   : > { %v2338_v21 = vpop.f32.mrb[20].mxu1  ;;  %v1842_v22 = vpop.f32.mrb[21].mxu0  ;;  %v1169_v9 = vpack.c.bf16 %v2336_v20, %v2336_v20 }
 0x119   : > { %v1850_v23 = vpop.f32.mrb[21].mxu1  ;;  %v871_v24 = vpop.f32.mrb[22].mxu0  ;;  %v1170_v15 = vpack.c.bf16 %v2338_v21, %v2338_v21 }
 0x11a   : > { %v923_v25 = vpop.f32.mrb[22].mxu1  ;;  %v1843_v26 = vpop.f32.mrb[23].mxu0  ;;  %v1268_v14 = vsel %vm1174_vm3, %v1169_v9, 0  ;;  %v1368_v23 = vsel %vm1174_vm3, %v1360_v19, 0 }
 0x11b   : > { %v1851_v27 = vpop.f32.mrb[23].mxu1  ;;  %v1314_v20 = vsel %vm1174_vm3, %v1170_v15, 0 }
 0x11c   : > { %v1361_v27 = vld [vmem:[%s2453_s4 + $0x4] sm:$0xf] }
 0x1dd   : > { %v975_v28 = vpop.f32.mrb[24].mxu0  ;;  %v1021_v29 = vpop.f32.mrb[24].mxu1 }
 0x1de   : > { %v1856_v30 = vpop.f32.mrb[25].mxu0  ;;  %v1862_v31 = vpop.f32.mrb[25].mxu1  ;;  %v1119_v32 = vsel %vm934_vm2, %v975_v28, -inf  ;;  %v1122_v37 = vsel %vm934_vm2, %v1021_v29, -inf }
 0x1df   : > { %v1024_v33 = vpop.f32.mrb[26].mxu1  ;;  %1120 = vmax.xlane.f32.xlu0 %v1119_v32  ;;  %v978_v34 = vpop.f32.mrb[26].mxu0 }
 0x1e0   : > { %v1857_v35 = vpop.f32.mrb[27].mxu0  ;;  %v1863_v36 = vpop.f32.mrb[27].mxu1 }
 0x1e1   : > { %v1363_v35 = vld [vmem:[%s2453_s4 + $0xc] sm:$0xf] }
 0x1e3   : > { %1123 = vmax.xlane.f32.xlu0 %v1122_v37 }
 0x1e5   : > { %v1067_v38 = vpop.f32.mrb[28].mxu0  ;;  %v1113_v39 = vpop.f32.mrb[28].mxu1 }
 0x1e6   : > { %v1868_v40 = vpop.f32.mrb[29].mxu0  ;;  %v1874_v41 = vpop.f32.mrb[29].mxu1  ;;  %v1125_v42 = vsel %vm934_vm2, %v1067_v38, -inf  ;;  %v1128_v47 = vsel %vm934_vm2, %v1113_v39, -inf }
 0x1e7   : > { %v1116_v43 = vpop.f32.mrb[30].mxu1  ;;  %1126 = vmax.xlane.f32.xlu1 %v1125_v42  ;;  %v1070_v44 = vpop.f32.mrb[30].mxu0  ;;  %v1506_v40 = vsel %vm1174_vm3, %v1363_v35, 0 }
 0x1e8   : > { %v1869_v45 = vpop.f32.mrb[31].mxu0  ;;  %v1875_v46 = vpop.f32.mrb[31].mxu1 }
 0x1eb   : > { %1129 = vmax.xlane.f32.xlu1 %v1128_v47 }
 0x26c   : > { %v1121_v48 = vpop.xlane.xlu0 %1120 }
 0x26d   : > { %v1131_v49 = vsub.f32 %v975_v28, %v1121_v48  ;;  %v1414_v28 = vsel %vm1174_vm3, %v1361_v27, 0 }
 0x26f   : > { %v1135_v50 = vmul.f32 1.442695, %v1131_v49 }
 0x270   : > { %v1124_v51 = vpop.xlane.xlu0 %1123 }
 0x271   : > { %1989 = vpow2.f32 %v1135_v50  ;;  %v1132_v52 = vsub.f32 %v1021_v29, %v1124_v51  ;;  %v1362_v29 = vld [vmem:[%s2453_s4 + $0x8] sm:$0xf] }
 0x272   : > { %v1460_v33 = vsel %vm1174_vm3, %v1362_v29, 0 }
 0x273   : > { %v1137_v53 = vmul.f32 1.442695, %v1132_v52 }
 0x274   : > { %v1127_v54 = vpop.xlane.xlu1 %1126 }
 0x275   : > { %1991 = vpow2.f32 %v1137_v53  ;;  %v1133_v55 = vsub.f32 %v1067_v38, %v1127_v54 }
 0x277   : > { %v1139_v56 = vmul.f32 1.442695, %v1133_v55 }
 0x278   : > { %v1130_v57 = vpop.xlane.xlu1 %1129 }
 0x279   : > { %1993 = vpow2.f32 %v1139_v56  ;;  %v1134_v58 = vsub.f32 %v1113_v39, %v1130_v57 }
 0x27b   : > { %v1990_v59 = vpop.eup %1989  ;;  %v1141_v60 = vmul.f32 1.442695, %v1134_v58 }
 0x27c   : > { %v1143_v61 = vsel %vm934_vm2, %v1990_v59, 0.0 }
 0x27d   : > { %1995 = vpow2.f32 %v1141_v60  ;;  %1144 = vadd.xlane.f32.xlu0 %v1143_v61 }
 0x27f   : > { %v1992_v62 = vpop.eup %1991 }
 0x280   : > { %v1146_v63 = vsel %vm934_vm2, %v1992_v62, 0.0 }
 0x281   : > { %1147 = vadd.xlane.f32.xlu1 %v1146_v63 }
 0x283   : > { %v1994_v0 = vpop.eup %1993 }
 0x284   : > { %v1149_v2 = vsel %vm934_vm2, %v1994_v0, 0.0 }
 0x285   : > { %1150 = vadd.xlane.f32.xlu0 %v1149_v2 }
 0x287   : > { %v1996_v3 = vpop.eup %1995 }
 0x288   : > { %v1152_v4 = vsel %vm934_vm2, %v1996_v3, 0.0 }
 0x289   : > { %1153 = vadd.xlane.f32.xlu1 %v1152_v4 }
 0x30a   : > { %v1145_v5 = vpop.xlane.xlu0 %1144 }
 0x30b   : > { %1997 = vrcp.f32 %v1145_v5 }
 0x30e   : > { %v1148_v6 = vpop.xlane.xlu1 %1147 }
 0x30f   : > { %1999 = vrcp.f32 %v1148_v6 }
 0x312   : > { %v1151_v7 = vpop.xlane.xlu0 %1150 }
 0x313   : > { %2001 = vrcp.f32 %v1151_v7 }
 0x315   : > { %v1998_v8 = vpop.eup %1997 }
 0x316   : > { %v1159_v10 = vmul.f32 %v1998_v8, %v1990_v59  ;;  %v1154_v11 = vpop.xlane.xlu1 %1153  ;;  %v1691_v8 = vld [vmem:[%s2454_s5] ss:$0 sm:$0xff] }
 0x317   : > { %2003 = vrcp.f32 %v1154_v11 }
 0x318   : > { %v1163_v12 = vpack.c.bf16 %v1159_v10, %v1159_v10 }
 0x319   : > { %v2000_v13 = vpop.eup %1999 }
 0x31a   : > { %v1160_v16 = vmul.f32 %v2000_v13, %v1992_v62  ;;  %1879 = vmatmul.mubr.msk.bf16.vlgmr.msra.gmra.mrb[32].mxu0 %vm934_vm2, %v1163_v12 }
 0x31b   : > { %1889 = vmatpush3.bf16.msra.mxu0 %v1268_v14  ;;  %1890 = vmatprep.mubr.msk.bf16.mxu0 %vm2070_vm0, %v2069_v1 }
 0x31c   : > { %v1164_v17 = vpack.c.bf16 %v1160_v16, %v1160_v16  ;;  %1900 = vmatprep.subr.bf16.mxu0 %v2069_v1 }
 0x31d   : > { %v2002_v18 = vpop.eup %2001 }
 0x31e   : > { %v1161_v22 = vmul.f32 %v2002_v18, %v1994_v0  ;;  %1885 = vmatmul.mubr.msk.bf16.vlgmr.msra.gmra.mrb[32].mxu1 %vm934_vm2, %v1164_v17 }
 0x31f   : > { %1895 = vmatpush3.bf16.msra.mxu1 %v1314_v20  ;;  %1896 = vmatprep.mubr.msk.bf16.mxu1 %vm2070_vm0, %v2069_v1 }
 0x320   : > { %v1165_v21 = vpack.c.bf16 %v1161_v22, %v1161_v22  ;;  %1906 = vmatprep.subr.bf16.mxu1 %v2069_v1 }
 0x321   : > { %v2004_v24 = vpop.eup %2003 }
 0x322   : > { %v1162_v25 = vmul.f32 %v2004_v24, %v1996_v3  ;;  %1891 = vmatmul.mubr.msk.bf16.vlgmr.msra.gmra.mrb[36].mxu0 %vm934_vm2, %v1165_v21 }
 0x323   : > { %1901 = vmatpush3.bf16.msra.mxu0 %v1368_v23  ;;  %1902 = vmatprep.mubr.msk.bf16.mxu0 %vm2070_vm0, %v2069_v1 }
 0x324   : > { %v1166_v26 = vpack.c.bf16 %v1162_v25, %v1162_v25  ;;  %1912 = vmatprep.subr.bf16.mxu0 %v2069_v1 }
 0x326   : > { %1897 = vmatmul.mubr.msk.bf16.vlgmr.msra.gmra.mrb[36].mxu1 %vm934_vm2, %v1166_v26 }
 0x327   : > { %1908 = vmatprep.mubr.msk.bf16.mxu1 %vm2070_vm0, %v2069_v1  ;;  %1907 = vmatpush3.bf16.msra.mxu1 %v1414_v28 }
 0x328   : > { %1918 = vmatprep.subr.bf16.mxu1 %v2069_v1 }
 0x3ed   : > { %v1212_v30 = vpop.f32.mrb[32].mxu0 }
 0x3ee   : > { %v1356_v31 = vpack.c.bf16 %v1212_v30, %v1212_v30  ;;  %v1880_v32 = vpop.f32.mrb[33].mxu0 }
 0x3ef   : > { %v1215_v34 = vpop.f32.mrb[34].mxu0 }
 0x3f0   : > { %v1881_v36 = vpop.f32.mrb[35].mxu0  ;;  %1903 = vmatmul.mubr.msk.bf16.vlgmr.msra.gmra.mrb[40].mxu0 %vm934_vm2, %v1356_v31 }
 0x3f1   : > { %v1258_v37 = vpop.f32.mrb[32].mxu1  ;;  %1913 = vmatpush3.bf16.msra.mxu0 %v1460_v33  ;;  %1914 = vmatprep.mubr.msk.bf16.mxu0 %vm2070_vm0, %v2069_v1 }
 0x3f2   : > { %v1357_v38 = vpack.c.bf16 %v1258_v37, %v1258_v37  ;;  %v1886_v39 = vpop.f32.mrb[33].mxu1 }
 0x3f3   : > { %v1261_v41 = vpop.f32.mrb[34].mxu1 }
 0x3f4   : > { %v1887_v42 = vpop.f32.mrb[35].mxu1  ;;  %1909 = vmatmul.mubr.msk.bf16.vlgmr.msra.gmra.mrb[40].mxu1 %vm934_vm2, %v1357_v38 }
 0x3f5   : > { %v1304_v43 = vpop.f32.mrb[36].mxu0  ;;  %1919 = vmatpush3.bf16.msra.mxu1 %v1506_v40  ;;  %1920 = vmatprep.mubr.msk.bf16.mxu1 %vm2070_vm0, %v2069_v1 }
 0x3f6   : > { %v1358_v44 = vpack.c.bf16 %v1304_v43, %v1304_v43  ;;  %v1892_v45 = vpop.f32.mrb[37].mxu0 }
 0x3f7   : > { %v1307_v46 = vpop.f32.mrb[38].mxu0 }
 0x3f8   : > { %v1893_v47 = vpop.f32.mrb[39].mxu0  ;;  %1915 = vmatmul.mubr.msk.bf16.vlgmr.msra.gmra.mrb[44].mxu0 %vm934_vm2, %v1358_v44 }
 0x3f9   : > { %v1350_v48 = vpop.f32.mrb[36].mxu1 }
 0x3fa   : > { %v1359_v49 = vpack.c.bf16 %v1350_v48, %v1350_v48  ;;  %v1898_v50 = vpop.f32.mrb[37].mxu1 }
 0x3fb   : > { %v1353_v51 = vpop.f32.mrb[38].mxu1 }
 0x3fc   : > { %v1899_v52 = vpop.f32.mrb[39].mxu1  ;;  %1921 = vmatmul.mubr.msk.bf16.vlgmr.msra.gmra.mrb[44].mxu1 %vm934_vm2, %v1359_v49 }
 0x4c3   : > { %v1404_v53 = vpop.f32.mrb[40].mxu0 }
 0x4c4   : > { %v1904_v54 = vpop.f32.mrb[41].mxu0  ;;  %v1548_v1 = vsel %vm278_vm1, %v1404_v53, 0.0 }
 0x4c5   : > { %v1407_v55 = vpop.f32.mrb[42].mxu0 }
 0x4c6   : > { %v1905_v56 = vpop.f32.mrb[43].mxu0 }
 0x4c7   : > { %v1450_v57 = vpop.f32.mrb[40].mxu1 }
 0x4c8   : > { %v1549_v58 = vsel %vm278_vm1, %v1450_v57, 0.0  ;;  %v1910_v59 = vpop.f32.mrb[41].mxu1 }
 0x4c9   : > { %v1550_v60 = vadd.f32 %v1549_v58, %v1548_v1  ;;  %v1453_v61 = vpop.f32.mrb[42].mxu1 }
 0x4ca   : > { %v1911_v62 = vpop.f32.mrb[43].mxu1 }
 0x4cb   : > { %v1496_v63 = vpop.f32.mrb[44].mxu0 }
 0x4cc   : > { %v1551_v0 = vsel %vm278_vm1, %v1496_v63, 0.0  ;;  %v1916_v2 = vpop.f32.mrb[45].mxu0 }
 0x4cd   : > { %v1552_v3 = vadd.f32 %v1551_v0, %v1550_v60  ;;  %v1499_v4 = vpop.f32.mrb[46].mxu0 }
 0x4ce   : > { %v1917_v5 = vpop.f32.mrb[47].mxu0 }
 0x4cf   : > { %v1542_v6 = vpop.f32.mrb[44].mxu1 }
 0x4d0   : > { %v1553_v7 = vsel %vm278_vm1, %v1542_v6, 0.0  ;;  %v1922_v9 = vpop.f32.mrb[45].mxu1 }
 0x4d1   : > { %v1554_v10 = vadd.f32 %v1553_v7, %v1552_v3  ;;  %v1545_v11 = vpop.f32.mrb[46].mxu1 }
 0x4d2   : > { %v1923_v12 = vpop.f32.mrb[47].mxu1 }
 0x4d3   : > { %v1562_v13 = vadd.f32 %v1691_v8, %v1554_v10 }
 0x4d5   : > { %1563 = vst.msk [vmem:[%s242_s15] sm:$0xff] %vm278_vm1, %v1562_v13 }
 0x4d6   : > { %2018 = shalt.err (!%p2015_p3)
}
 0x4d7   : > { %s2019_s9 = scalar_lea.hbm %s2406_s19, 128  ;;  %s2023_s12 = scalar_lea.hbm %s2455_s6, 256 }
 0x4d8   : > { %p2020_p4 = scmp.ne.s32.totalorder %s2406_s19, %s2019_s9  ;;  %p2024_p9 = scmp.lt.u32.totalorder %s2406_s19, %s2455_s6 }
 0x4d9   : > { %p2025_p10 = scmp.lt.u32.totalorder %s2023_s12, %s2019_s9  ;;  %p2027_p12 = scmp.lt.u32.totalorder %s2019_s9, %s2406_s19 }
 0x4da   : > { %p2021_p7 = pnand %p2020_p4, %p2145_p5 }
 0x4db   : > { %p2026_p11 = por %p2025_p10, %p2024_p9 }
 0x4dc   : > { %p2022_p8 = pneg %p2021_p7 }
 0x4dd   : > { %p2028_p13 = por %p2027_p12, %p2026_p11 }
 0x4df   : > { %p2029_p0 = pnand %p2028_p13, %p2022_p8 }
 0x4e1   : > { %2032 = shalt.err (!%p2029_p0)
}
 0x4e2   : > { %1924 = dma.vmem_to_hbm [thread:$0]  (%p2145_p5), %s2408_s16, 128, %s2406_s19, %s1565_s20  }
 0x4e3 PF: > { %p1930_p1 = scmp.ge.s32.totalorder %s2067_s24, 2  ;;  %s1590_s15 = sand.u32 1, %s2055_s21  }
 0x4e4   : > { %s1591_s17 = scalar_lea.sflag [#allocation3], %s1590_s15 }
 0x4e5   : > { %p1927_p2 = pnand %p1930_p1, %p2149_p6 }
 0x4e7   : > { %2050 = dma.done.wait (!%p1927_p2), %s1591_s17, 128  }
 0x4e8   : > { %2052 = vsyncadd (!%p1927_p2), %s1591_s17, 4294967168  ;;  %p16_p3 = scmp.ge.s32.totalorder %s2132_s27, 4   ;;  %s2458_s21 = smov %s2059_s22 }
 0x4e9   : > { %s2459_s22 = smov %s2063_s23  ;;  %s2460_s23 = smov %s2143_s30 }
 0x4ea   : > { %s2461_s24 = smov %s2132_s27  ;;  %18 = sbr.rel (!%p16_p3) target bundleno = 3 (0x3), region = 79 }
 0x4f1   :  { %1596 = vsyncpa [#allocation3], 1 }
 0x4f2   :  { %1598 = vsyncpa [#allocation3 + $0x1], 1 }

</bundles_post_ra>
